<compile_context>
chip_gen: v7x
topology: tpu7x:2x2x1
jax: 0.10.0
libtpu: 0.0.40
codegen_flags: <defaults>
</compile_context>

<pallas_src>
import jax
import jax.numpy as jnp
from jax.experimental import pallas as pl
from jax.experimental.pallas import tpu as pltpu

MAX_TB = 8192  # max batch-tile rows (keeps double-buffered VMEM ~4 MiB)


def mlp_kernel(x_ref, w1_ref, b1_ref, w2_ref, b2_ref, w3_ref, b3_ref, o_ref):
    # x arrives as f32; cast to bf16 on the VPU (free slack) for the MXU.
    x = x_ref[...].astype(jnp.bfloat16)

    # Linear(60 -> 30) + Tanh   (bf16 operands, f32 accumulate)
    h1 = jnp.dot(x, w1_ref[...], preferred_element_type=jnp.float32)
    h1 = jnp.tanh(h1 + b1_ref[...])

    # Linear(30 -> 15) + ReLU
    h2 = jnp.dot(h1.astype(jnp.bfloat16), w2_ref[...],
                 preferred_element_type=jnp.float32)
    h2 = jnp.maximum(h2 + b2_ref[...], 0.0)

    # Linear(15 -> 6)
    out = jnp.dot(h2.astype(jnp.bfloat16), w3_ref[...],
                  preferred_element_type=jnp.float32)
    o_ref[...] = (out + b3_ref[...]).astype(o_ref.dtype)


def _round_up(n, m):
    return (n + m - 1) // m * m


@jax.jit
def neural_network_forward(x, w1, b1, w2, b2, w3, b3):
    """y = relu(tanh(x @ w1 + b1) @ w2 + b2) @ w3 + b3, weights stored as (in, out)."""
    B, in_dim = x.shape
    out_dim = w3.shape[1]

    # Weights -> bf16 MXU operands (tiny one-time casts); biases stay f32.
    w1b = w1.astype(jnp.bfloat16)
    w2b = w2.astype(jnp.bfloat16)
    w3b = w3.astype(jnp.bfloat16)
    b1f = b1.reshape(1, -1).astype(jnp.float32)
    b2f = b2.reshape(1, -1).astype(jnp.float32)
    b3f = b3.reshape(1, -1).astype(jnp.float32)

    # x stays f32 — cast to bf16 happens inside the kernel.
    xf = x.astype(jnp.float32)

    # Batch tiling: big tiles (amortize per-step overhead) but multiple of 8
    # sublanes; ragged last block handled by Pallas (no wrapper-side padding).
    TB = min(MAX_TB, _round_up(max(B, 1), 8))
    grid = (pl.cdiv(B, TB),)

    out = pl.pallas_call(
        mlp_kernel,
        out_shape=jax.ShapeDtypeStruct((B, out_dim), jnp.float32),
        grid=grid,
        in_specs=[
            pl.BlockSpec((TB, in_dim), lambda i: (i, 0)),   # x: tiled over batch
            pl.BlockSpec(w1b.shape, lambda i: (0, 0)),      # weights/biases:
            pl.BlockSpec(b1f.shape, lambda i: (0, 0)),      #   VMEM-resident,
            pl.BlockSpec(w2b.shape, lambda i: (0, 0)),      #   constant block idx
            pl.BlockSpec(b2f.shape, lambda i: (0, 0)),
            pl.BlockSpec(w3b.shape, lambda i: (0, 0)),
            pl.BlockSpec(b3f.shape, lambda i: (0, 0)),
        ],
        out_specs=pl.BlockSpec((TB, out_dim), lambda i: (i, 0)),
        compiler_params=pltpu.CompilerParams(
            dimension_semantics=("parallel",)),
    )(xf, w1b, b1f, w2b, b2f, w3b, b3f)

    return out


def init_linear_params(key, fan_in, fan_out):
    # Mimics PyTorch's default U(-1/sqrt(fan_in), 1/sqrt(fan_in)).
    kw, kb = jax.random.split(key)
    bound = 1.0 / jnp.sqrt(jnp.float32(fan_in))
    # Stored as (in, out) so the kernel computes x @ W + b (== nn.Linear's x W^T + b).
    w = jax.random.uniform(kw, (fan_in, fan_out), jnp.float32, -bound, bound)
    b = jax.random.uniform(kb, (1, fan_out), jnp.float32, -bound, bound)
    return w, b


def reference_forward(x, w1, b1, w2, b2, w3, b3):
    # Plain-JAX reference mirroring the kernel's bf16-operand / f32-accumulate math.
    bf = lambda a: a.astype(jnp.bfloat16).astype(jnp.float32)
    h1 = jnp.tanh(bf(x) @ bf(w1) + b1)
    h2 = jnp.maximum(bf(h1) @ bf(w2) + b2, 0.0)
    return bf(h2) @ bf(w3) + b3


if __name__ == "__main__":
    key = jax.random.PRNGKey(0)
    k_x, k1, k2, k3 = jax.random.split(key, 4)

    w1, b1 = init_linear_params(k1, 60, 30)
    w2, b2 = init_linear_params(k2, 30, 15)
    w3, b3 = init_linear_params(k3, 15, 6)

    # Small deterministic batch.
    B = 8
    x = jax.random.normal(k_x, (B, 60), jnp.float32)
    out = jax.block_until_ready(neural_network_forward(x, w1, b1, w2, b2, w3, b3))
    ref = reference_forward(x, w1, b1, w2, b2, w3, b3)
    assert out.shape == (B, 6)
    assert jnp.allclose(out, ref, atol=2e-2, rtol=2e-2)

    # Non-multiple-of-8 batch exercises the ragged-last-block path.
    B2 = 37
    x2 = jax.random.normal(k_x, (B2, 60), jnp.float32)
    out2 = jax.block_until_ready(neural_network_forward(x2, w1, b1, w2, b2, w3, b3))
    ref2 = reference_forward(x2, w1, b1, w2, b2, w3, b3)
    assert out2.shape == (B2, 6)
    assert jnp.allclose(out2, ref2, atol=2e-2, rtol=2e-2)

    print("KERNEL_OK")
</pallas_src>

<mosaic_0001>
module attributes {stable_mosaic.version = 11 : i64} {
  func.func @mlp_kernel(%arg0: i32, %arg1: memref<8x60xf32, #tpu.memory_space<vmem>>, %arg2: memref<60x30xbf16, #tpu.memory_space<vmem>>, %arg3: memref<1x30xf32, #tpu.memory_space<vmem>>, %arg4: memref<30x15xbf16, #tpu.memory_space<vmem>>, %arg5: memref<1x15xf32, #tpu.memory_space<vmem>>, %arg6: memref<15x6xbf16, #tpu.memory_space<vmem>>, %arg7: memref<1x6xf32, #tpu.memory_space<vmem>>, %arg8: memref<8x6xf32, #tpu.memory_space<vmem>>) attributes {dimension_semantics = [#tpu.dimension_semantics<parallel>], iteration_bounds = array<i64: 1>, scalar_prefetch = 0 : i64, scratch_operands = 0 : i64, tpu.core_type = #tpu.core_type<tc>, window_params = [{transform_indices = @transform_0, window_bounds = array<i64: 8, 60>}, {pipeline_mode = #tpu.pipeline_mode<synchronous>, transform_indices = @transform_1, window_bounds = array<i64: 60, 30>}, {pipeline_mode = #tpu.pipeline_mode<synchronous>, transform_indices = @transform_2, window_bounds = array<i64: 1, 30>}, {pipeline_mode = #tpu.pipeline_mode<synchronous>, transform_indices = @transform_3, window_bounds = array<i64: 30, 15>}, {pipeline_mode = #tpu.pipeline_mode<synchronous>, transform_indices = @transform_4, window_bounds = array<i64: 1, 15>}, {pipeline_mode = #tpu.pipeline_mode<synchronous>, transform_indices = @transform_5, window_bounds = array<i64: 15, 6>}, {pipeline_mode = #tpu.pipeline_mode<synchronous>, transform_indices = @transform_6, window_bounds = array<i64: 1, 6>}, {transform_indices = @transform_7, window_bounds = array<i64: 8, 6>}]} {
    %c0 = arith.constant 0 : index
    %c0_0 = arith.constant 0 : index
    %0 = vector.load %arg1[%c0, %c0_0] : memref<8x60xf32, #tpu.memory_space<vmem>>, vector<8x60xf32>
    %1 = arith.truncf %0 : vector<8x60xf32> to vector<8x60xbf16>
    %c0_1 = arith.constant 0 : index
    %c0_2 = arith.constant 0 : index
    %2 = vector.load %arg2[%c0_1, %c0_2] : memref<60x30xbf16, #tpu.memory_space<vmem>>, vector<60x30xbf16>
    %cst = arith.constant dense<0.000000e+00> : vector<8x30xf32>
    %3 = tpu.matmul %1, %2, %cst {dimension_numbers = #tpu.dot_dimension_numbers<[1], [0], [0], [1], [0, 0, 1, 1], [], []>} : vector<8x60xbf16>, vector<60x30xbf16>, vector<8x30xf32> -> vector<8x30xf32>
    %c0_3 = arith.constant 0 : index
    %c0_4 = arith.constant 0 : index
    %4 = vector.load %arg3[%c0_3, %c0_4] : memref<1x30xf32, #tpu.memory_space<vmem>>, vector<1x30xf32>
    %5 = vector.broadcast %4 : vector<1x30xf32> to vector<8x30xf32>
    %6 = arith.addf %3, %5 : vector<8x30xf32>
    %7 = math.tanh %6 : vector<8x30xf32>
    %8 = arith.truncf %7 : vector<8x30xf32> to vector<8x30xbf16>
    %c0_5 = arith.constant 0 : index
    %c0_6 = arith.constant 0 : index
    %9 = vector.load %arg4[%c0_5, %c0_6] : memref<30x15xbf16, #tpu.memory_space<vmem>>, vector<30x15xbf16>
    %cst_7 = arith.constant dense<0.000000e+00> : vector<8x15xf32>
    %10 = tpu.matmul %8, %9, %cst_7 {dimension_numbers = #tpu.dot_dimension_numbers<[1], [0], [0], [1], [0, 0, 1, 1], [], []>} : vector<8x30xbf16>, vector<30x15xbf16>, vector<8x15xf32> -> vector<8x15xf32>
    %c0_8 = arith.constant 0 : index
    %c0_9 = arith.constant 0 : index
    %11 = vector.load %arg5[%c0_8, %c0_9] : memref<1x15xf32, #tpu.memory_space<vmem>>, vector<1x15xf32>
    %12 = vector.broadcast %11 : vector<1x15xf32> to vector<8x15xf32>
    %13 = arith.addf %10, %12 : vector<8x15xf32>
    %cst_10 = arith.constant 0.000000e+00 : f32
    %14 = vector.broadcast %cst_10 : f32 to vector<8x15xf32>
    %15 = arith.maximumf %13, %14 : vector<8x15xf32>
    %16 = arith.truncf %15 : vector<8x15xf32> to vector<8x15xbf16>
    %c0_11 = arith.constant 0 : index
    %c0_12 = arith.constant 0 : index
    %17 = vector.load %arg6[%c0_11, %c0_12] : memref<15x6xbf16, #tpu.memory_space<vmem>>, vector<15x6xbf16>
    %cst_13 = arith.constant dense<0.000000e+00> : vector<8x6xf32>
    %18 = tpu.matmul %16, %17, %cst_13 {dimension_numbers = #tpu.dot_dimension_numbers<[1], [0], [0], [1], [0, 0, 1, 1], [], []>} : vector<8x15xbf16>, vector<15x6xbf16>, vector<8x6xf32> -> vector<8x6xf32>
    %c0_14 = arith.constant 0 : index
    %c0_15 = arith.constant 0 : index
    %19 = vector.load %arg7[%c0_14, %c0_15] : memref<1x6xf32, #tpu.memory_space<vmem>>, vector<1x6xf32>
    %20 = vector.broadcast %19 : vector<1x6xf32> to vector<8x6xf32>
    %21 = arith.addf %18, %20 : vector<8x6xf32>
    %c0_16 = arith.constant 0 : index
    %c0_17 = arith.constant 0 : index
    %22 = vector.load %arg8[%c0_16, %c0_17] : memref<8x6xf32, #tpu.memory_space<vmem>>, vector<8x6xf32>
    tpu.vector_store %arg8[%c0_16, %c0_17], %21 {strides = array<i32>} : memref<8x6xf32, #tpu.memory_space<vmem>>, vector<8x6xf32>,
    return
  }
  func.func @transform_0(%arg0: i32) -> (i32, i32) {
    %c0_i32 = arith.constant 0 : i32
    %c0_i32_0 = arith.constant 0 : i32
    return %arg0, %c0_i32 : i32, i32
  }
  func.func @transform_1(%arg0: i32) -> (i32, i32) {
    %c0_i32 = arith.constant 0 : i32
    %c0_i32_0 = arith.constant 0 : i32
    %c0_i32_1 = arith.constant 0 : i32
    return %c0_i32, %c0_i32_0 : i32, i32
  }
  func.func @transform_2(%arg0: i32) -> (i32, i32) {
    %c0_i32 = arith.constant 0 : i32
    %c0_i32_0 = arith.constant 0 : i32
    %c0_i32_1 = arith.constant 0 : i32
    return %c0_i32, %c0_i32_0 : i32, i32
  }
  func.func @transform_3(%arg0: i32) -> (i32, i32) {
    %c0_i32 = arith.constant 0 : i32
    %c0_i32_0 = arith.constant 0 : i32
    %c0_i32_1 = arith.constant 0 : i32
    return %c0_i32, %c0_i32_0 : i32, i32
  }
  func.func @transform_4(%arg0: i32) -> (i32, i32) {
    %c0_i32 = arith.constant 0 : i32
    %c0_i32_0 = arith.constant 0 : i32
    %c0_i32_1 = arith.constant 0 : i32
    return %c0_i32, %c0_i32_0 : i32, i32
  }
  func.func @transform_5(%arg0: i32) -> (i32, i32) {
    %c0_i32 = arith.constant 0 : i32
    %c0_i32_0 = arith.constant 0 : i32
    %c0_i32_1 = arith.constant 0 : i32
    return %c0_i32, %c0_i32_0 : i32, i32
  }
  func.func @transform_6(%arg0: i32) -> (i32, i32) {
    %c0_i32 = arith.constant 0 : i32
    %c0_i32_0 = arith.constant 0 : i32
    %c0_i32_1 = arith.constant 0 : i32
    return %c0_i32, %c0_i32_0 : i32, i32
  }
  func.func @transform_7(%arg0: i32) -> (i32, i32) {
    %c0_i32 = arith.constant 0 : i32
    %c0_i32_0 = arith.constant 0 : i32
    return %arg0, %c0_i32 : i32, i32
  }
}

</mosaic_0001>

<bundles_post_ra>
// kernel: neural_network_forward.1
= control target key start
LH: loop header
LB: loop body
LE: loop exit
PB: predicated region body
PF: predicated region fallthrough
CT: control target
= control target key end

     0   :  { %v356_v1 = vmov 0.0   ;;  %vm357_vm0 = vmmov 0   ;;  %s448_s0 = inlined_call_operand.vmem [shape: f32[8,60], index: 0, kind: input, shape index: {}]   ;;  %s449_s1 = inlined_call_operand.vmem [shape: bf16[60,30], index: 1, kind: input, shape index: {}]   ;;  %s450_s2 = inlined_call_operand.vmem [shape: f32[1,30], index: 2, kind: input, shape index: {}]   ;;  %s451_s3 = inlined_call_operand.vmem [shape: bf16[30,15], index: 3, kind: input, shape index: {}]   ;;  %s452_s4 = inlined_call_operand.vmem [shape: f32[1,15], index: 4, kind: input, shape index: {}]   ;;  %s453_s5 = inlined_call_operand.vmem [shape: bf16[15,6], index: 5, kind: input, shape index: {}]   ;;  %s454_s6 = inlined_call_operand.vmem [shape: f32[1,6], index: 6, kind: input, shape index: {}]   ;;  %s455_s7 = inlined_call_operand.hbm [shape: f32[8,6], index: 7, kind: output, shape index: {}]  }
   0x1   :  { %v323_v0 = vld [vmem:[%s449_s1] sm:$0xff]   ;;  %293 = vmatprep.subr.bf16.mxu0 %v356_v1  ;;  %305 = vmatprep.subr.bf16.mxu1 %v356_v1  ;;  %v324_v2 = vld [vmem:[%s449_s1 + $0x8] sm:$0xff]   ;;  %v325_v3 = vld [vmem:[%s449_s1 + $0x10] sm:$0xff]  }
   0x2   :  { %294 = vmatpush3.bf16.msra.mxu0 %v323_v0  ;;  %301 = vmatprep.mubr.msk.bf16.mxu0 %vm357_vm0, %v356_v1  ;;  %v326_v4 = vld [vmem:[%s449_s1 + $0x18] sm:$0x3f]  }
   0x3   :  { %295 = vmatprep.subr.bf16.mxu0 %v356_v1  ;;  %309 = vmatprep.mubr.msk.bf16.mxu1 %vm357_vm0, %v356_v1 }
   0x6   :  { %296 = vmatpush3.bf16.msra.mxu0 %v324_v2 }
   0x7   :  { %297 = vmatprep.subr.bf16.mxu0 %v356_v1 }
   0x8   :  { %12 = vsyncpa [#allocation3], 0  ;;  %vm72_vm1 = vcmask 1045504   ;;  %v28_v5 = vld [vmem:[%s448_s0] sm:$0xff]  ;;  %vm68_vm2 = vcmask 490496   ;;  %vm144_vm3 = vcmask 1046528  }
   0x9   :  { %v74_v6 = vsel %vm72_vm1, %v326_v4, 0  ;;  %v29_v7 = vpack.c.bf16 %v28_v5, %v28_v5  ;;  %v327_v8 = vld [vmem:[%s451_s3] sm:$0xff]   ;;  %v328_v9 = vld [vmem:[%s451_s3 + $0x8] sm:$0x7f]   ;;  %vm208_vm4 = vcmask 1047552   ;;  %v358_v17 = vmov 65535  }
   0xa   :  { %298 = vmatpush3.bf16.msra.mxu0 %v325_v3  ;;  %306 = vmatpush3.bf16.msra.mxu1 %v327_v8  ;;  %v146_v10 = vsel %vm144_vm3, %v328_v9, 0  ;;  %v270_v11 = vld [vmem:[%s450_s2] ss:$0 sm:$0xff]  ;;  %v209_v18 = vsel %vm144_vm3, 4294967295, %v358_v17  ;;  %vm140_vm5 = vcmask 244736   ;;  %vm204_vm6 = vcmask 121856  }
   0xb   :  { %299 = vmatprep.subr.bf16.mxu0 %v356_v1  ;;  %307 = vmatprep.subr.bf16.mxu1 %v356_v1  ;;  %v329_v19 = vld [vmem:[%s453_s5] sm:$0xff]   ;;  %v210_v20 = vsel %vm208_vm4, %v209_v18, 0  ;;  %s359_s18 = smov [#allocation2]   ;;  %vm254_vm7 = vcmask 48128  }
   0xc   :  { %v212_v22 = vand.u32 %v329_v19, %v210_v20  ;;  %v276_v24 = vld [vmem:[%s452_s4] ss:$0 sm:$0xff]  ;;  %s262_s19 = sshll.u32 %s359_s18, 4  ;;  %s263_s19 = int_to_ptr.vmem [resolvable:$true] %s262_s19 }
   0xd   :  { %v280_v32 = vld [vmem:[%s454_s6] ss:$0 sm:$0xff]  ;;  %s332_s4 = scalar_lea.vmem %s263_s19, 128  ;;  %p337_p1 = scmp.lt.s32.totalorder %s263_s19, %s263_s19 }
   0xe   :  { %300 = vmatpush3.bf16.msra.mxu0 %v74_v6  ;;  %308 = vmatpush3.bf16.msra.mxu1 %v146_v10  ;;  %p333_p0 = scmp.ne.s32.totalorder %s263_s19, %s332_s4  ;;  %p338_p2 = scmp.lt.s32.totalorder %s332_s4, %s332_s4 }
   0xf   :  { %313 = vmatprep.subr.bf16.mxu1 %v356_v1 }
  0x10   :  { %p339_p3 = por %p338_p2, %p337_p1 }
  0x11   :  { %302 = vmatmul.mubr.msk.bf16.vlgmr.msra.gmra.mrb[0].mxu0 %vm68_vm2, %v29_v7 }
  0x12   :  { %p340_p4 = pnand %p339_p3, %p333_p0 }
  0xe4   :  { %v110_v12 = vpop.f32.mrb[0].mxu0 }
  0xe5   :  { %v111_v13 = vadd.f32 %v270_v11, %v110_v12  ;;  %v303_v14 = vpop.f32.mrb[1].mxu0 }
  0xe6   :  { %v113_v15 = vpop.f32.mrb[2].mxu0 }
  0xe7   :  { %330 = vtanh.f32 %v111_v13  ;;  %v304_v16 = vpop.f32.mrb[3].mxu0 }
  0xf1   :  { %v331_v21 = vpop.eup %330 }
  0xf2   :  { %v117_v23 = vpack.c.bf16 %v331_v21, %v331_v21 }
  0xf4   :  { %310 = vmatmul.mubr.msk.bf16.vlgmr.msra.gmra.mrb[0].mxu1 %vm140_vm5, %v117_v23 }
  0xf5   :  { %314 = vmatpush3.bf16.msra.mxu1 %v212_v22  ;;  %315 = vmatprep.mubr.msk.bf16.mxu1 %vm357_vm0, %v356_v1 }
 0x1c7   :  { %v182_v25 = vpop.f32.mrb[0].mxu1 }
 0x1c8   :  { %v183_v26 = vadd.f32 %v276_v24, %v182_v25  ;;  %v311_v27 = vpop.f32.mrb[1].mxu1 }
 0x1c9   :  { %v185_v28 = vpop.f32.mrb[2].mxu1 }
 0x1ca   :  { %v188_v29 = vmax.f32 %v183_v26, 0.0  ;;  %v312_v30 = vpop.f32.mrb[3].mxu1 }
 0x1cc   :  { %v189_v31 = vpack.c.bf16 %v188_v29, %v188_v29 }
 0x1ce   :  { %316 = vmatmul.mubr.msk.bf16.vlgmr.msra.gmra.mrb[4].mxu1 %vm204_vm6, %v189_v31 }
 0x2a1   :  { %v248_v33 = vpop.f32.mrb[4].mxu1 }
 0x2a2   :  { %v249_v34 = vadd.f32 %v280_v32, %v248_v33  ;;  %v317_v35 = vpop.f32.mrb[5].mxu1 }
 0x2a3   :  { %v251_v36 = vpop.f32.mrb[6].mxu1 }
 0x2a4   :  { %v318_v37 = vpop.f32.mrb[7].mxu1  ;;  %255 = vst.msk [vmem:[#allocation2] sm:$0xff] %vm254_vm7, %v249_v34 }
 0x2a5   :  { %343 = shalt.err (!%p340_p4)
}
 0x2a6   :  { %s344_s6 = scalar_lea.hbm %s455_s7, 128 }
 0x2a7   :  { %p345_p5 = scmp.ne.s32.totalorder %s455_s7, %s344_s6  ;;  %p348_p6 = scmp.lt.u32.totalorder %s344_s6, %s455_s7 }
 0x2a9   :  { %p350_p7 = pnand %p348_p6, %p345_p5 }
 0x2ab   :  { %353 = shalt.err (!%p350_p7)
}
 0x2ac   :  { %265 = dma.vmem_to_hbm [thread:$0]  %s263_s19, 128, %s455_s7, [#allocation3]  }
 0x2ad   :  { %354 = dma.done.wait [#allocation3], 128  }
 0x2ae   :  { %355 = vsyncadd [#allocation3], 4294967168 }
 0x2af   :  { %269 = vsyncpa [#allocation3], 1 }

</bundles_post_ra>
